<compile_context>
chip_gen: v6e
topology: v6e:2x2x1
jax: 0.10.0
libtpu: 0.0.40
codegen_flags: <defaults>
</compile_context>

<pallas_src>
import functools

import jax
import jax.numpy as jnp
from jax.experimental import pallas as pl
from jax.experimental.pallas import tpu as pltpu

N_EMBD = 32
N_HEAD = 4
BLOCK_SIZE = 8          # sequence length T (== block_size)
FF_WIDTH = 4
HEAD_DIM = N_EMBD // N_HEAD
EPS = 1e-5
NEG_INF = -1e30


def _normalize(x):
    """LayerNorm without affine (gamma/beta folded into downstream weights)."""
    mu = jnp.mean(x, axis=-1, keepdims=True)
    var = jnp.mean((x - mu) ** 2, axis=-1, keepdims=True)
    return (x - mu) * jax.lax.rsqrt(var + EPS)


def block_kernel(x_ref, mask_ref, wqkv_ref, bqkv_ref, wo_ref, bo_ref,
                 w1_ref, b1_ref, w2_ref, b2_ref, o_ref, *, bb, seq_len):
    """One grid step processes `bb` whole sequences = bb * seq_len rows."""
    rows, C = x_ref.shape
    T = seq_len
    x = x_ref[...].astype(jnp.float32)                      # (rows, C)

    # ---------------- self-attention branch: x + Wo(MHA(ln1(x))) -----------
    hn = _normalize(x)
    # fused Q|K|V projection: one (rows, C) @ (C, 3C) matmul.
    # LN gamma and the 1/sqrt(D) attention scale are pre-folded into wqkv;
    # LN beta is pre-folded into bqkv.
    qkv = jnp.dot(hn, wqkv_ref[...],
                  preferred_element_type=jnp.float32) + bqkv_ref[...]

    mask = mask_ref[...][None, :, :]                        # (1, T, T) additive
    wo = wo_ref[...]                                        # (C, C)

    sa = jnp.zeros((rows, C), jnp.float32)
    for hidx in range(N_HEAD):                              # static unroll (4)
        lo = hidx * HEAD_DIM
        qh = qkv[:, lo:lo + HEAD_DIM].reshape(bb, T, HEAD_DIM)
        kh = qkv[:, C + lo:C + lo + HEAD_DIM].reshape(bb, T, HEAD_DIM)
        vh = qkv[:, 2 * C + lo:2 * C + lo + HEAD_DIM].reshape(bb, T, HEAD_DIM)
        s = jnp.einsum('bqd,bkd->bqk', qh, kh,
                       preferred_element_type=jnp.float32) + mask
        s = s - jnp.max(s, axis=-1, keepdims=True)
        p = jnp.exp(s)
        p = p * pl.reciprocal(jnp.sum(p, axis=-1, keepdims=True), approx=True)
        oh = jnp.einsum('bqk,bkd->bqd', p, vh,
                        preferred_element_type=jnp.float32)  # (bb, T, D)
        # fold this head's output through its slice of the output projection
        sa = sa + jnp.dot(oh.reshape(rows, HEAD_DIM),
                          wo[lo:lo + HEAD_DIM, :],
                          preferred_element_type=jnp.float32)
    # nn.Dropout is identity in eval mode
    x = x + sa + bo_ref[...]

    # ---------------- feed-forward branch: x + W2(relu(W1(ln2(x)))) --------
    h2 = _normalize(x)
    f = jnp.dot(h2, w1_ref[...],
                preferred_element_type=jnp.float32) + b1_ref[...]
    f = jnp.maximum(f, 0.0)
    x = x + jnp.dot(f, w2_ref[...],
                    preferred_element_type=jnp.float32) + b2_ref[...]

    o_ref[...] = x.astype(o_ref.dtype)


def init_params(key):
    ks = jax.random.split(key, 8)
    C, F = N_EMBD, FF_WIDTH * N_EMBD
    s = 0.02
    return dict(
        ln1_g=jnp.ones((1, C), jnp.float32),
        ln1_b=jnp.zeros((1, C), jnp.float32),
        wq=jax.random.normal(ks[0], (C, C), jnp.float32) * s,
        wk=jax.random.normal(ks[1], (C, C), jnp.float32) * s,
        wv=jax.random.normal(ks[2], (C, C), jnp.float32) * s,
        wo=jax.random.normal(ks[3], (C, C), jnp.float32) * s,
        bo=jnp.zeros((1, C), jnp.float32),
        ln2_g=jnp.ones((1, C), jnp.float32),
        ln2_b=jnp.zeros((1, C), jnp.float32),
        w1=jax.random.normal(ks[4], (C, F), jnp.float32) * s,
        b1=jnp.zeros((1, F), jnp.float32),
        w2=jax.random.normal(ks[5], (F, C), jnp.float32) * s,
        b2=jnp.zeros((1, C), jnp.float32),
    )


def _pick_batch_block(B, T, target_rows=256, max_rows=1024):
    """Largest divisor BB of B with BB*T <= max_rows, stopping once the slab
    reaches ~target_rows (fills MXU M-dim; keeps >=2 grid blocks at realistic
    B so v7x can shard the parallel axis across both TensorCores)."""
    best = 1
    for bb in range(1, B + 1):
        if B % bb != 0:
            continue
        if bb * T > max_rows:
            break
        best = bb
        if bb * T >= target_rows:
            break
    return best


@jax.jit
def self_attention_block(x, params):
    B, T, C = x.shape
    bb = _pick_batch_block(B, T)
    rows = bb * T
    n_blocks = B // bb

    scale = 1.0 / (HEAD_DIM ** 0.5)
    # Fuse Q/K/V weights into one (C, 3C) operand and fold the attention scale
    # into the Q columns (wrapper-side, negligible, mathematically identical).
    wqkv_base = jnp.concatenate(
        [params["wq"] * scale, params["wk"], params["wv"]], axis=1)
    # Fold LayerNorm affine params into the downstream projections:
    #   ln(x) @ W = normalize(x) @ (diag(g) W) + (b_ln @ W)
    wqkv = params["ln1_g"].T * wqkv_base                    # (C, 3C)
    bqkv = params["ln1_b"] @ wqkv_base                      # (1, 3C)
    w1 = params["ln2_g"].T * params["w1"]                   # (C, F)
    b1 = params["ln2_b"] @ params["w1"] + params["b1"]      # (1, F)

    # Additive causal mask, built once (not per grid step).
    mask = jnp.where(jnp.tril(jnp.ones((T, T), bool)),
                     0.0, NEG_INF).astype(jnp.float32)

    plist = [mask, wqkv, bqkv, params["wo"], params["bo"],
             w1, b1, params["w2"], params["b2"]]

    def full_spec(arr):
        return pl.BlockSpec(tuple(arr.shape), lambda i: (0, 0))

    in_specs = [pl.BlockSpec((rows, C), lambda i: (i, 0))]
    in_specs += [full_spec(p) for p in plist]

    kernel = functools.partial(block_kernel, bb=bb, seq_len=T)

    out = pl.pallas_call(
        kernel,
        out_shape=jax.ShapeDtypeStruct((B * T, C), x.dtype),
        grid=(n_blocks,),
        in_specs=in_specs,
        out_specs=pl.BlockSpec((rows, C), lambda i: (i, 0)),
        compiler_params=pltpu.CompilerParams(
            dimension_semantics=("parallel",)),
    )(x.reshape(B * T, C), *plist)
    return out.reshape(B, T, C)


def reference_block(x, params):
    """Pure-JAX reference mirroring the PyTorch forward (eval mode)."""
    def ln(v, g, b):
        mu = jnp.mean(v, axis=-1, keepdims=True)
        var = jnp.mean((v - mu) ** 2, axis=-1, keepdims=True)
        return (v - mu) / jnp.sqrt(var + EPS) * g + b

    B, T, C = x.shape
    h = ln(x, params["ln1_g"][0], params["ln1_b"][0])
    q = h @ params["wq"]
    k = h @ params["wk"]
    v = h @ params["wv"]
    q = q.reshape(B, T, N_HEAD, HEAD_DIM).transpose(0, 2, 1, 3)
    k = k.reshape(B, T, N_HEAD, HEAD_DIM).transpose(0, 2, 1, 3)
    v = v.reshape(B, T, N_HEAD, HEAD_DIM).transpose(0, 2, 1, 3)
    s = jnp.einsum("bhqd,bhkd->bhqk", q, k) / (HEAD_DIM ** 0.5)
    mask = jnp.tril(jnp.ones((T, T), bool))
    s = jnp.where(mask, s, NEG_INF)
    p = jax.nn.softmax(s, axis=-1)
    attn = jnp.einsum("bhqk,bhkd->bhqd", p, v).transpose(0, 2, 1, 3).reshape(B, T, C)
    x = x + attn @ params["wo"] + params["bo"][0]
    h2 = ln(x, params["ln2_g"][0], params["ln2_b"][0])
    f = jnp.maximum(h2 @ params["w1"] + params["b1"][0], 0.0)
    x = x + f @ params["w2"] + params["b2"][0]
    return x


if __name__ == "__main__":
    key = jax.random.PRNGKey(0)
    kx, kp = jax.random.split(key)
    params = init_params(kp)

    # small case (single grid block) + a larger case exercising a multi-block grid
    for B in (2, 64):
        x = jax.random.normal(jax.random.fold_in(kx, B),
                              (B, BLOCK_SIZE, N_EMBD), jnp.float32)
        out = jax.block_until_ready(self_attention_block(x, params))
        ref = reference_block(x, params)
        assert out.shape == (B, BLOCK_SIZE, N_EMBD)
        err = jnp.max(jnp.abs(out - ref))
        assert jnp.allclose(out, ref, atol=1e-3, rtol=1e-3), (
            f"B={B} max abs err {err}")
    # TODO(synk): dropout layers are treated as eval-mode identity (p=0.2 train
    # mode would need pltpu.prng_* masking).
    print("KERNEL_OK")
</pallas_src>

<mosaic_0001>
module attributes {stable_mosaic.version = 11 : i64} {
  func.func @block_kernel(%arg0: i32, %arg1: memref<16x32xf32, #tpu.memory_space<vmem>>, %arg2: memref<8x8xf32, #tpu.memory_space<vmem>>, %arg3: memref<32x96xf32, #tpu.memory_space<vmem>>, %arg4: memref<1x96xf32, #tpu.memory_space<vmem>>, %arg5: memref<32x32xf32, #tpu.memory_space<vmem>>, %arg6: memref<1x32xf32, #tpu.memory_space<vmem>>, %arg7: memref<32x128xf32, #tpu.memory_space<vmem>>, %arg8: memref<1x128xf32, #tpu.memory_space<vmem>>, %arg9: memref<128x32xf32, #tpu.memory_space<vmem>>, %arg10: memref<1x32xf32, #tpu.memory_space<vmem>>, %arg11: memref<16x32xf32, #tpu.memory_space<vmem>>) attributes {dimension_semantics = [#tpu.dimension_semantics<parallel>], iteration_bounds = array<i64: 1>, scalar_prefetch = 0 : i64, scratch_operands = 0 : i64, tpu.core_type = #tpu.core_type<tc>, window_params = [{transform_indices = @transform_0, window_bounds = array<i64: 16, 32>}, {pipeline_mode = #tpu.pipeline_mode<synchronous>, transform_indices = @transform_1, window_bounds = array<i64: 8, 8>}, {pipeline_mode = #tpu.pipeline_mode<synchronous>, transform_indices = @transform_2, window_bounds = array<i64: 32, 96>}, {pipeline_mode = #tpu.pipeline_mode<synchronous>, transform_indices = @transform_3, window_bounds = array<i64: 1, 96>}, {pipeline_mode = #tpu.pipeline_mode<synchronous>, transform_indices = @transform_4, window_bounds = array<i64: 32, 32>}, {pipeline_mode = #tpu.pipeline_mode<synchronous>, transform_indices = @transform_5, window_bounds = array<i64: 1, 32>}, {pipeline_mode = #tpu.pipeline_mode<synchronous>, transform_indices = @transform_6, window_bounds = array<i64: 32, 128>}, {pipeline_mode = #tpu.pipeline_mode<synchronous>, transform_indices = @transform_7, window_bounds = array<i64: 1, 128>}, {pipeline_mode = #tpu.pipeline_mode<synchronous>, transform_indices = @transform_8, window_bounds = array<i64: 128, 32>}, {pipeline_mode = #tpu.pipeline_mode<synchronous>, transform_indices = @transform_9, window_bounds = array<i64: 1, 32>}, {transform_indices = @transform_10, window_bounds = array<i64: 16, 32>}]} {
    %c0 = arith.constant 0 : index
    %c0_0 = arith.constant 0 : index
    %0 = vector.load %arg1[%c0, %c0_0] : memref<16x32xf32, #tpu.memory_space<vmem>>, vector<16x32xf32>
    %cst = arith.constant dense<0.000000e+00> : vector<16xf32>
    %1 = vector.multi_reduction <add>, %0, %cst [1] : vector<16x32xf32> to vector<16xf32>
    %2 = vector.shape_cast %1 : vector<16xf32> to vector<16x1xf32>
    %cst_1 = arith.constant 3.200000e+01 : f32
    %3 = vector.broadcast %cst_1 : f32 to vector<16x1xf32>
    %4 = arith.divf %2, %3 : vector<16x1xf32>
    %5 = vector.broadcast %4 : vector<16x1xf32> to vector<16x32xf32>
    %6 = arith.subf %0, %5 : vector<16x32xf32>
    %7 = arith.mulf %6, %6 : vector<16x32xf32>
    %cst_2 = arith.constant dense<0.000000e+00> : vector<16xf32>
    %8 = vector.multi_reduction <add>, %7, %cst_2 [1] : vector<16x32xf32> to vector<16xf32>
    %9 = vector.shape_cast %8 : vector<16xf32> to vector<16x1xf32>
    %cst_3 = arith.constant 3.200000e+01 : f32
    %10 = vector.broadcast %cst_3 : f32 to vector<16x1xf32>
    %11 = arith.divf %9, %10 : vector<16x1xf32>
    %12 = vector.broadcast %4 : vector<16x1xf32> to vector<16x32xf32>
    %13 = arith.subf %0, %12 : vector<16x32xf32>
    %cst_4 = arith.constant 9.99999974E-6 : f32
    %14 = vector.broadcast %cst_4 : f32 to vector<16x1xf32>
    %15 = arith.addf %11, %14 : vector<16x1xf32>
    %16 = math.rsqrt %15 : vector<16x1xf32>
    %17 = vector.broadcast %16 : vector<16x1xf32> to vector<16x32xf32>
    %18 = arith.mulf %13, %17 : vector<16x32xf32>
    %c0_5 = arith.constant 0 : index
    %c0_6 = arith.constant 0 : index
    %19 = vector.load %arg3[%c0_5, %c0_6] : memref<32x96xf32, #tpu.memory_space<vmem>>, vector<32x96xf32>
    %cst_7 = arith.constant dense<0.000000e+00> : vector<16x96xf32>
    %20 = tpu.matmul %18, %19, %cst_7 {dimension_numbers = #tpu.dot_dimension_numbers<[1], [0], [0], [1], [0, 0, 1, 1], [], []>} : vector<16x32xf32>, vector<32x96xf32>, vector<16x96xf32> -> vector<16x96xf32>
    %c0_8 = arith.constant 0 : index
    %c0_9 = arith.constant 0 : index
    %21 = vector.load %arg4[%c0_8, %c0_9] : memref<1x96xf32, #tpu.memory_space<vmem>>, vector<1x96xf32>
    %22 = vector.broadcast %21 : vector<1x96xf32> to vector<16x96xf32>
    %23 = arith.addf %20, %22 : vector<16x96xf32>
    %c0_10 = arith.constant 0 : index
    %c0_11 = arith.constant 0 : index
    %24 = vector.load %arg2[%c0_10, %c0_11] : memref<8x8xf32, #tpu.memory_space<vmem>>, vector<8x8xf32>
    %25 = vector.shape_cast %24 : vector<8x8xf32> to vector<1x8x8xf32>
    %c0_12 = arith.constant 0 : index
    %c0_13 = arith.constant 0 : index
    %26 = vector.load %arg5[%c0_12, %c0_13] : memref<32x32xf32, #tpu.memory_space<vmem>>, vector<32x32xf32>
    %cst_14 = arith.constant 0.000000e+00 : f32
    %27 = vector.broadcast %cst_14 : f32 to vector<16x32xf32>
    %28 = vector.extract_strided_slice %23 {offsets = [0, 0], sizes = [16, 8], strides = [1, 1]} : vector<16x96xf32> to vector<16x8xf32>
    %29 = vector.shape_cast %28 : vector<16x8xf32> to vector<2x8x8xf32>
    %30 = vector.extract_strided_slice %23 {offsets = [0, 32], sizes = [16, 8], strides = [1, 1]} : vector<16x96xf32> to vector<16x8xf32>
    %31 = vector.shape_cast %30 : vector<16x8xf32> to vector<2x8x8xf32>
    %32 = vector.extract_strided_slice %23 {offsets = [0, 64], sizes = [16, 8], strides = [1, 1]} : vector<16x96xf32> to vector<16x8xf32>
    %33 = vector.shape_cast %32 : vector<16x8xf32> to vector<2x8x8xf32>
    "tpu.trace_start"() <{level = 10 : i32, message = "bqd,bkd->bqk"}> : () -> ()
    %cst_15 = arith.constant dense<0.000000e+00> : vector<2x8x8xf32>
    %34 = tpu.matmul %29, %31, %cst_15 {dimension_numbers = #tpu.dot_dimension_numbers<[2], [2], [1], [1], [0, 0, 0, 1, 1, 1], [0], [0]>} : vector<2x8x8xf32>, vector<2x8x8xf32>, vector<2x8x8xf32> -> vector<2x8x8xf32>
    "tpu.trace_stop"() : () -> ()
    %35 = vector.broadcast %25 : vector<1x8x8xf32> to vector<2x8x8xf32>
    %36 = arith.addf %34, %35 : vector<2x8x8xf32>
    %cst_16 = arith.constant dense<0xFF800000> : vector<2x8xf32>
    %37 = vector.multi_reduction <maximumf>, %36, %cst_16 [2] : vector<2x8x8xf32> to vector<2x8xf32>
    %38 = vector.shape_cast %37 : vector<2x8xf32> to vector<2x8x1xf32>
    %39 = vector.broadcast %38 : vector<2x8x1xf32> to vector<2x8x8xf32>
    %40 = arith.subf %36, %39 : vector<2x8x8xf32>
    %41 = math.exp %40 : vector<2x8x8xf32>
    %cst_17 = arith.constant dense<0.000000e+00> : vector<2x8xf32>
    %42 = vector.multi_reduction <add>, %41, %cst_17 [2] : vector<2x8x8xf32> to vector<2x8xf32>
    %43 = vector.shape_cast %42 : vector<2x8xf32> to vector<2x8x1xf32>
    %44 = tpu.reciprocal %43 {approx = true} : vector<2x8x1xf32> -> vector<2x8x1xf32>
    %45 = vector.broadcast %44 : vector<2x8x1xf32> to vector<2x8x8xf32>
    %46 = arith.mulf %41, %45 : vector<2x8x8xf32>
    "tpu.trace_start"() <{level = 10 : i32, message = "bqk,bkd->bqd"}> : () -> ()
    %cst_18 = arith.constant dense<0.000000e+00> : vector<2x8x8xf32>
    %47 = tpu.matmul %46, %33, %cst_18 {dimension_numbers = #tpu.dot_dimension_numbers<[2], [1], [1], [2], [0, 0, 0, 1, 1, 2], [0], [0]>} : vector<2x8x8xf32>, vector<2x8x8xf32>, vector<2x8x8xf32> -> vector<2x8x8xf32>
    "tpu.trace_stop"() : () -> ()
    %48 = vector.shape_cast %47 : vector<2x8x8xf32> to vector<16x8xf32>
    %49 = vector.extract_strided_slice %26 {offsets = [0, 0], sizes = [8, 32], strides = [1, 1]} : vector<32x32xf32> to vector<8x32xf32>
    %cst_19 = arith.constant dense<0.000000e+00> : vector<16x32xf32>
    %50 = tpu.matmul %48, %49, %cst_19 {dimension_numbers = #tpu.dot_dimension_numbers<[1], [0], [0], [1], [0, 0, 1, 1], [], []>} : vector<16x8xf32>, vector<8x32xf32>, vector<16x32xf32> -> vector<16x32xf32>
    %51 = arith.addf %27, %50 : vector<16x32xf32>
    %52 = vector.extract_strided_slice %23 {offsets = [0, 8], sizes = [16, 8], strides = [1, 1]} : vector<16x96xf32> to vector<16x8xf32>
    %53 = vector.shape_cast %52 : vector<16x8xf32> to vector<2x8x8xf32>
    %54 = vector.extract_strided_slice %23 {offsets = [0, 40], sizes = [16, 8], strides = [1, 1]} : vector<16x96xf32> to vector<16x8xf32>
    %55 = vector.shape_cast %54 : vector<16x8xf32> to vector<2x8x8xf32>
    %56 = vector.extract_strided_slice %23 {offsets = [0, 72], sizes = [16, 8], strides = [1, 1]} : vector<16x96xf32> to vector<16x8xf32>
    %57 = vector.shape_cast %56 : vector<16x8xf32> to vector<2x8x8xf32>
    "tpu.trace_start"() <{level = 10 : i32, message = "bqd,bkd->bqk"}> : () -> ()
    %cst_20 = arith.constant dense<0.000000e+00> : vector<2x8x8xf32>
    %58 = tpu.matmul %53, %55, %cst_20 {dimension_numbers = #tpu.dot_dimension_numbers<[2], [2], [1], [1], [0, 0, 0, 1, 1, 1], [0], [0]>} : vector<2x8x8xf32>, vector<2x8x8xf32>, vector<2x8x8xf32> -> vector<2x8x8xf32>
    "tpu.trace_stop"() : () -> ()
    %59 = vector.broadcast %25 : vector<1x8x8xf32> to vector<2x8x8xf32>
    %60 = arith.addf %58, %59 : vector<2x8x8xf32>
    %cst_21 = arith.constant dense<0xFF800000> : vector<2x8xf32>
    %61 = vector.multi_reduction <maximumf>, %60, %cst_21 [2] : vector<2x8x8xf32> to vector<2x8xf32>
    %62 = vector.shape_cast %61 : vector<2x8xf32> to vector<2x8x1xf32>
    %63 = vector.broadcast %62 : vector<2x8x1xf32> to vector<2x8x8xf32>
    %64 = arith.subf %60, %63 : vector<2x8x8xf32>
    %65 = math.exp %64 : vector<2x8x8xf32>
    %cst_22 = arith.constant dense<0.000000e+00> : vector<2x8xf32>
    %66 = vector.multi_reduction <add>, %65, %cst_22 [2] : vector<2x8x8xf32> to vector<2x8xf32>
    %67 = vector.shape_cast %66 : vector<2x8xf32> to vector<2x8x1xf32>
    %68 = tpu.reciprocal %67 {approx = true} : vector<2x8x1xf32> -> vector<2x8x1xf32>
    %69 = vector.broadcast %68 : vector<2x8x1xf32> to vector<2x8x8xf32>
    %70 = arith.mulf %65, %69 : vector<2x8x8xf32>
    "tpu.trace_start"() <{level = 10 : i32, message = "bqk,bkd->bqd"}> : () -> ()
    %cst_23 = arith.constant dense<0.000000e+00> : vector<2x8x8xf32>
    %71 = tpu.matmul %70, %57, %cst_23 {dimension_numbers = #tpu.dot_dimension_numbers<[2], [1], [1], [2], [0, 0, 0, 1, 1, 2], [0], [0]>} : vector<2x8x8xf32>, vector<2x8x8xf32>, vector<2x8x8xf32> -> vector<2x8x8xf32>
    "tpu.trace_stop"() : () -> ()
    %72 = vector.shape_cast %71 : vector<2x8x8xf32> to vector<16x8xf32>
    %73 = vector.extract_strided_slice %26 {offsets = [8, 0], sizes = [8, 32], strides = [1, 1]} : vector<32x32xf32> to vector<8x32xf32>
    %cst_24 = arith.constant dense<0.000000e+00> : vector<16x32xf32>
    %74 = tpu.matmul %72, %73, %cst_24 {dimension_numbers = #tpu.dot_dimension_numbers<[1], [0], [0], [1], [0, 0, 1, 1], [], []>} : vector<16x8xf32>, vector<8x32xf32>, vector<16x32xf32> -> vector<16x32xf32>
    %75 = arith.addf %51, %74 : vector<16x32xf32>
    %76 = vector.extract_strided_slice %23 {offsets = [0, 16], sizes = [16, 8], strides = [1, 1]} : vector<16x96xf32> to vector<16x8xf32>
    %77 = vector.shape_cast %76 : vector<16x8xf32> to vector<2x8x8xf32>
    %78 = vector.extract_strided_slice %23 {offsets = [0, 48], sizes = [16, 8], strides = [1, 1]} : vector<16x96xf32> to vector<16x8xf32>
    %79 = vector.shape_cast %78 : vector<16x8xf32> to vector<2x8x8xf32>
    %80 = vector.extract_strided_slice %23 {offsets = [0, 80], sizes = [16, 8], strides = [1, 1]} : vector<16x96xf32> to vector<16x8xf32>
    %81 = vector.shape_cast %80 : vector<16x8xf32> to vector<2x8x8xf32>
    "tpu.trace_start"() <{level = 10 : i32, message = "bqd,bkd->bqk"}> : () -> ()
    %cst_25 = arith.constant dense<0.000000e+00> : vector<2x8x8xf32>
    %82 = tpu.matmul %77, %79, %cst_25 {dimension_numbers = #tpu.dot_dimension_numbers<[2], [2], [1], [1], [0, 0, 0, 1, 1, 1], [0], [0]>} : vector<2x8x8xf32>, vector<2x8x8xf32>, vector<2x8x8xf32> -> vector<2x8x8xf32>
    "tpu.trace_stop"() : () -> ()
    %83 = vector.broadcast %25 : vector<1x8x8xf32> to vector<2x8x8xf32>
    %84 = arith.addf %82, %83 : vector<2x8x8xf32>
    %cst_26 = arith.constant dense<0xFF800000> : vector<2x8xf32>
    %85 = vector.multi_reduction <maximumf>, %84, %cst_26 [2] : vector<2x8x8xf32> to vector<2x8xf32>
    %86 = vector.shape_cast %85 : vector<2x8xf32> to vector<2x8x1xf32>
    %87 = vector.broadcast %86 : vector<2x8x1xf32> to vector<2x8x8xf32>
    %88 = arith.subf %84, %87 : vector<2x8x8xf32>
    %89 = math.exp %88 : vector<2x8x8xf32>
    %cst_27 = arith.constant dense<0.000000e+00> : vector<2x8xf32>
    %90 = vector.multi_reduction <add>, %89, %cst_27 [2] : vector<2x8x8xf32> to vector<2x8xf32>
    %91 = vector.shape_cast %90 : vector<2x8xf32> to vector<2x8x1xf32>
    %92 = tpu.reciprocal %91 {approx = true} : vector<2x8x1xf32> -> vector<2x8x1xf32>
    %93 = vector.broadcast %92 : vector<2x8x1xf32> to vector<2x8x8xf32>
    %94 = arith.mulf %89, %93 : vector<2x8x8xf32>
    "tpu.trace_start"() <{level = 10 : i32, message = "bqk,bkd->bqd"}> : () -> ()
    %cst_28 = arith.constant dense<0.000000e+00> : vector<2x8x8xf32>
    %95 = tpu.matmul %94, %81, %cst_28 {dimension_numbers = #tpu.dot_dimension_numbers<[2], [1], [1], [2], [0, 0, 0, 1, 1, 2], [0], [0]>} : vector<2x8x8xf32>, vector<2x8x8xf32>, vector<2x8x8xf32> -> vector<2x8x8xf32>
    "tpu.trace_stop"() : () -> ()
    %96 = vector.shape_cast %95 : vector<2x8x8xf32> to vector<16x8xf32>
    %97 = vector.extract_strided_slice %26 {offsets = [16, 0], sizes = [8, 32], strides = [1, 1]} : vector<32x32xf32> to vector<8x32xf32>
    %cst_29 = arith.constant dense<0.000000e+00> : vector<16x32xf32>
    %98 = tpu.matmul %96, %97, %cst_29 {dimension_numbers = #tpu.dot_dimension_numbers<[1], [0], [0], [1], [0, 0, 1, 1], [], []>} : vector<16x8xf32>, vector<8x32xf32>, vector<16x32xf32> -> vector<16x32xf32>
    %99 = arith.addf %75, %98 : vector<16x32xf32>
    %100 = vector.extract_strided_slice %23 {offsets = [0, 24], sizes = [16, 8], strides = [1, 1]} : vector<16x96xf32> to vector<16x8xf32>
    %101 = vector.shape_cast %100 : vector<16x8xf32> to vector<2x8x8xf32>
    %102 = vector.extract_strided_slice %23 {offsets = [0, 56], sizes = [16, 8], strides = [1, 1]} : vector<16x96xf32> to vector<16x8xf32>
    %103 = vector.shape_cast %102 : vector<16x8xf32> to vector<2x8x8xf32>
    %104 = vector.extract_strided_slice %23 {offsets = [0, 88], sizes = [16, 8], strides = [1, 1]} : vector<16x96xf32> to vector<16x8xf32>
    %105 = vector.shape_cast %104 : vector<16x8xf32> to vector<2x8x8xf32>
    "tpu.trace_start"() <{level = 10 : i32, message = "bqd,bkd->bqk"}> : () -> ()
    %cst_30 = arith.constant dense<0.000000e+00> : vector<2x8x8xf32>
    %106 = tpu.matmul %101, %103, %cst_30 {dimension_numbers = #tpu.dot_dimension_numbers<[2], [2], [1], [1], [0, 0, 0, 1, 1, 1], [0], [0]>} : vector<2x8x8xf32>, vector<2x8x8xf32>, vector<2x8x8xf32> -> vector<2x8x8xf32>
    "tpu.trace_stop"() : () -> ()
    %107 = vector.broadcast %25 : vector<1x8x8xf32> to vector<2x8x8xf32>
    %108 = arith.addf %106, %107 : vector<2x8x8xf32>
    %cst_31 = arith.constant dense<0xFF800000> : vector<2x8xf32>
    %109 = vector.multi_reduction <maximumf>, %108, %cst_31 [2] : vector<2x8x8xf32> to vector<2x8xf32>
    %110 = vector.shape_cast %109 : vector<2x8xf32> to vector<2x8x1xf32>
    %111 = vector.broadcast %110 : vector<2x8x1xf32> to vector<2x8x8xf32>
    %112 = arith.subf %108, %111 : vector<2x8x8xf32>
    %113 = math.exp %112 : vector<2x8x8xf32>
    %cst_32 = arith.constant dense<0.000000e+00> : vector<2x8xf32>
    %114 = vector.multi_reduction <add>, %113, %cst_32 [2] : vector<2x8x8xf32> to vector<2x8xf32>
    %115 = vector.shape_cast %114 : vector<2x8xf32> to vector<2x8x1xf32>
    %116 = tpu.reciprocal %115 {approx = true} : vector<2x8x1xf32> -> vector<2x8x1xf32>
    %117 = vector.broadcast %116 : vector<2x8x1xf32> to vector<2x8x8xf32>
    %118 = arith.mulf %113, %117 : vector<2x8x8xf32>
    "tpu.trace_start"() <{level = 10 : i32, message = "bqk,bkd->bqd"}> : () -> ()
    %cst_33 = arith.constant dense<0.000000e+00> : vector<2x8x8xf32>
    %119 = tpu.matmul %118, %105, %cst_33 {dimension_numbers = #tpu.dot_dimension_numbers<[2], [1], [1], [2], [0, 0, 0, 1, 1, 2], [0], [0]>} : vector<2x8x8xf32>, vector<2x8x8xf32>, vector<2x8x8xf32> -> vector<2x8x8xf32>
    "tpu.trace_stop"() : () -> ()
    %120 = vector.shape_cast %119 : vector<2x8x8xf32> to vector<16x8xf32>
    %121 = vector.extract_strided_slice %26 {offsets = [24, 0], sizes = [8, 32], strides = [1, 1]} : vector<32x32xf32> to vector<8x32xf32>
    %cst_34 = arith.constant dense<0.000000e+00> : vector<16x32xf32>
    %122 = tpu.matmul %120, %121, %cst_34 {dimension_numbers = #tpu.dot_dimension_numbers<[1], [0], [0], [1], [0, 0, 1, 1], [], []>} : vector<16x8xf32>, vector<8x32xf32>, vector<16x32xf32> -> vector<16x32xf32>
    %123 = arith.addf %99, %122 : vector<16x32xf32>
    %124 = arith.addf %0, %123 : vector<16x32xf32>
    %c0_35 = arith.constant 0 : index
    %c0_36 = arith.constant 0 : index
    %125 = vector.load %arg6[%c0_35, %c0_36] : memref<1x32xf32, #tpu.memory_space<vmem>>, vector<1x32xf32>
    %126 = vector.broadcast %125 : vector<1x32xf32> to vector<16x32xf32>
    %127 = arith.addf %124, %126 : vector<16x32xf32>
    %cst_37 = arith.constant dense<0.000000e+00> : vector<16xf32>
    %128 = vector.multi_reduction <add>, %127, %cst_37 [1] : vector<16x32xf32> to vector<16xf32>
    %129 = vector.shape_cast %128 : vector<16xf32> to vector<16x1xf32>
    %cst_38 = arith.constant 3.200000e+01 : f32
    %130 = vector.broadcast %cst_38 : f32 to vector<16x1xf32>
    %131 = arith.divf %129, %130 : vector<16x1xf32>
    %132 = vector.broadcast %131 : vector<16x1xf32> to vector<16x32xf32>
    %133 = arith.subf %127, %132 : vector<16x32xf32>
    %134 = arith.mulf %133, %133 : vector<16x32xf32>
    %cst_39 = arith.constant dense<0.000000e+00> : vector<16xf32>
    %135 = vector.multi_reduction <add>, %134, %cst_39 [1] : vector<16x32xf32> to vector<16xf32>
    %136 = vector.shape_cast %135 : vector<16xf32> to vector<16x1xf32>
    %cst_40 = arith.constant 3.200000e+01 : f32
    %137 = vector.broadcast %cst_40 : f32 to vector<16x1xf32>
    %138 = arith.divf %136, %137 : vector<16x1xf32>
    %139 = vector.broadcast %131 : vector<16x1xf32> to vector<16x32xf32>
    %140 = arith.subf %127, %139 : vector<16x32xf32>
    %cst_41 = arith.constant 9.99999974E-6 : f32
    %141 = vector.broadcast %cst_41 : f32 to vector<16x1xf32>
    %142 = arith.addf %138, %141 : vector<16x1xf32>
    %143 = math.rsqrt %142 : vector<16x1xf32>
    %144 = vector.broadcast %143 : vector<16x1xf32> to vector<16x32xf32>
    %145 = arith.mulf %140, %144 : vector<16x32xf32>
    %c0_42 = arith.constant 0 : index
    %c0_43 = arith.constant 0 : index
    %146 = vector.load %arg7[%c0_42, %c0_43] : memref<32x128xf32, #tpu.memory_space<vmem>>, vector<32x128xf32>
    %cst_44 = arith.constant dense<0.000000e+00> : vector<16x128xf32>
    %147 = tpu.matmul %145, %146, %cst_44 {dimension_numbers = #tpu.dot_dimension_numbers<[1], [0], [0], [1], [0, 0, 1, 1], [], []>} : vector<16x32xf32>, vector<32x128xf32>, vector<16x128xf32> -> vector<16x128xf32>
    %c0_45 = arith.constant 0 : index
    %c0_46 = arith.constant 0 : index
    %148 = vector.load %arg8[%c0_45, %c0_46] : memref<1x128xf32, #tpu.memory_space<vmem>>, vector<1x128xf32>
    %149 = vector.broadcast %148 : vector<1x128xf32> to vector<16x128xf32>
    %150 = arith.addf %147, %149 : vector<16x128xf32>
    %cst_47 = arith.constant 0.000000e+00 : f32
    %151 = vector.broadcast %cst_47 : f32 to vector<16x128xf32>
    %152 = arith.maximumf %150, %151 : vector<16x128xf32>
    %c0_48 = arith.constant 0 : index
    %c0_49 = arith.constant 0 : index
    %153 = vector.load %arg9[%c0_48, %c0_49] : memref<128x32xf32, #tpu.memory_space<vmem>>, vector<128x32xf32>
    %cst_50 = arith.constant dense<0.000000e+00> : vector<16x32xf32>
    %154 = tpu.matmul %152, %153, %cst_50 {dimension_numbers = #tpu.dot_dimension_numbers<[1], [0], [0], [1], [0, 0, 1, 1], [], []>} : vector<16x128xf32>, vector<128x32xf32>, vector<16x32xf32> -> vector<16x32xf32>
    %155 = arith.addf %127, %154 : vector<16x32xf32>
    %c0_51 = arith.constant 0 : index
    %c0_52 = arith.constant 0 : index
    %156 = vector.load %arg10[%c0_51, %c0_52] : memref<1x32xf32, #tpu.memory_space<vmem>>, vector<1x32xf32>
    %157 = vector.broadcast %156 : vector<1x32xf32> to vector<16x32xf32>
    %158 = arith.addf %155, %157 : vector<16x32xf32>
    %c0_53 = arith.constant 0 : index
    %c0_54 = arith.constant 0 : index
    %159 = vector.load %arg11[%c0_53, %c0_54] : memref<16x32xf32, #tpu.memory_space<vmem>>, vector<16x32xf32>
    tpu.vector_store %arg11[%c0_53, %c0_54], %158 {strides = array<i32>} : memref<16x32xf32, #tpu.memory_space<vmem>>, vector<16x32xf32>,
    return
  }
  func.func @transform_0(%arg0: i32) -> (i32, i32) {
    %c0_i32 = arith.constant 0 : i32
    %c0_i32_0 = arith.constant 0 : i32
    return %arg0, %c0_i32 : i32, i32
  }
  func.func @transform_1(%arg0: i32) -> (i32, i32) {
    %c0_i32 = arith.constant 0 : i32
    %c0_i32_0 = arith.constant 0 : i32
    %c0_i32_1 = arith.constant 0 : i32
    return %c0_i32, %c0_i32_0 : i32, i32
  }
  func.func @transform_2(%arg0: i32) -> (i32, i32) {
    %c0_i32 = arith.constant 0 : i32
    %c0_i32_0 = arith.constant 0 : i32
    %c0_i32_1 = arith.constant 0 : i32
    return %c0_i32, %c0_i32_0 : i32, i32
  }
  func.func @transform_3(%arg0: i32) -> (i32, i32) {
    %c0_i32 = arith.constant 0 : i32
    %c0_i32_0 = arith.constant 0 : i32
    %c0_i32_1 = arith.constant 0 : i32
    return %c0_i32, %c0_i32_0 : i32, i32
  }
  func.func @transform_4(%arg0: i32) -> (i32, i32) {
    %c0_i32 = arith.constant 0 : i32
    %c0_i32_0 = arith.constant 0 : i32
    %c0_i32_1 = arith.constant 0 : i32
    return %c0_i32, %c0_i32_0 : i32, i32
  }
  func.func @transform_5(%arg0: i32) -> (i32, i32) {
    %c0_i32 = arith.constant 0 : i32
    %c0_i32_0 = arith.constant 0 : i32
    %c0_i32_1 = arith.constant 0 : i32
    return %c0_i32, %c0_i32_0 : i32, i32
  }
  func.func @transform_6(%arg0: i32) -> (i32, i32) {
    %c0_i32 = arith.constant 0 : i32
    %c0_i32_0 = arith.constant 0 : i32
    %c0_i32_1 = arith.constant 0 : i32
    return %c0_i32, %c0_i32_0 : i32, i32
  }
  func.func @transform_7(%arg0: i32) -> (i32, i32) {
    %c0_i32 = arith.constant 0 : i32
    %c0_i32_0 = arith.constant 0 : i32
    %c0_i32_1 = arith.constant 0 : i32
    return %c0_i32, %c0_i32_0 : i32, i32
  }
  func.func @transform_8(%arg0: i32) -> (i32, i32) {
    %c0_i32 = arith.constant 0 : i32
    %c0_i32_0 = arith.constant 0 : i32
    %c0_i32_1 = arith.constant 0 : i32
    return %c0_i32, %c0_i32_0 : i32, i32
  }
  func.func @transform_9(%arg0: i32) -> (i32, i32) {
    %c0_i32 = arith.constant 0 : i32
    %c0_i32_0 = arith.constant 0 : i32
    %c0_i32_1 = arith.constant 0 : i32
    return %c0_i32, %c0_i32_0 : i32, i32
  }
  func.func @transform_10(%arg0: i32) -> (i32, i32) {
    %c0_i32 = arith.constant 0 : i32
    %c0_i32_0 = arith.constant 0 : i32
    return %arg0, %c0_i32 : i32, i32
  }
}

</mosaic_0001>

<bundles_post_ra>
// kernel: self_attention_block.1
= control target key start
LH: loop header
LB: loop body
LE: loop exit
PB: predicated region body
PF: predicated region fallthrough
CT: control target
= control target key end

     0   :  { %vm38_vm0 = vcmask 261120   ;;  %s2783_s0 = inlined_call_operand.vmem [shape: f32[16,32], index: 0, kind: input, shape index: {}]   ;;  %s2784_s1 = inlined_call_operand.vmem [shape: f32[8,8], index: 1, kind: input, shape index: {}]   ;;  %s2785_s2 = inlined_call_operand.vmem [shape: f32[32,96], index: 2, kind: input, shape index: {}]   ;;  %s2786_s3 = inlined_call_operand.vmem [shape: f32[1,96], index: 3, kind: input, shape index: {}]   ;;  %s2787_s4 = inlined_call_operand.vmem [shape: f32[32,32], index: 4, kind: input, shape index: {}]   ;;  %s2788_s5 = inlined_call_operand.vmem [shape: f32[1,32], index: 5, kind: input, shape index: {}]   ;;  %s2789_s6 = inlined_call_operand.vmem [shape: f32[32,128], index: 6, kind: input, shape index: {}]   ;;  %s2790_s7 = inlined_call_operand.vmem [shape: f32[1,128], index: 7, kind: input, shape index: {}]   ;;  %s2791_s8 = inlined_call_operand.vmem [shape: f32[128,32], index: 8, kind: input, shape index: {}]   ;;  %s2792_s9 = inlined_call_operand.vmem [shape: f32[1,32], index: 9, kind: input, shape index: {}]   ;;  %s2793_s10 = inlined_call_operand.hbm [shape: f32[16,32], index: 10, kind: output, shape index: {}]  }
   0x1   :  { %v2484_v0 = vld [vmem:[%s2783_s0] sm:$0xff]  ;;  %v2489_v1 = vld [vmem:[%s2783_s0 + $0x8] sm:$0xff] }
   0x2   :  { %15 = vsyncpa [#allocation3], 0  ;;  %v39_v2 = vsel %vm38_vm0, %v2484_v0, 0.0  ;;  %v42_v3 = vsel %vm38_vm0, %v2489_v1, 0.0  ;;  %v69_v14 = vld [vmem:[%s2785_s2 + $0x18] sm:$0xff]  ;;  %v68_v15 = vld [vmem:[%s2785_s2 + $0x10] sm:$0xff] }
   0x3   :  { %40 = vadd.xlane.f32.xlu0 %v39_v2  ;;  %2175 = vmatprep.subr.mxu0 %v69_v14  ;;  %v67_v16 = vld [vmem:[%s2785_s2 + $0x8] sm:$0xff]  ;;  %v66_v17 = vld [vmem:[%s2785_s2] sm:$0xff]  ;;  %v2410_v28 = vmov 0.0   ;;  %vm2411_vm1 = vmmov 0   ;;  %s2412_s25 = smov 96   ;;  %vm166_vm2 = vcmask 64512  }
   0x4   :  { %2176 = vmatpush3.msra.mxu0 %v69_v14  ;;  %2211 = vmatprep.subr.mxu1 %v2410_v28  ;;  %v2061_v29 = vld [vmem:[%s2786_s3] ss:$0 sm:$0xff]  ;;  %s2413_s27 = smov 64   ;;  %s2414_s28 = smov 88  }
   0x5   :  { %2177 = vmatprep.subr.mxu0 %v68_v15  ;;  %2213 = vmatprep.mubr.msk.f32.mxu1 %vm2411_vm1, %v2410_v28  ;;  %v2543_v36 = vld [vmem:[%s2784_s1] sm:$0xff]  ;;  %s2415_s1 = smov 120   ;;  %s2416_s29 = smov 56  }
   0x6   :  { %2178 = vmatpush3.msra.mxu0 %v68_v15  ;;  %s2417_s30 = smov 80   ;;  %s2418_s11 = smov 112  }
   0x7   :  { %43 = vadd.xlane.f32.xlu0 %v42_v3  ;;  %2179 = vmatprep.subr.mxu0 %v67_v16  ;;  %s2419_s16 = smov 48   ;;  %s2420_s0 = smov 72  }
   0x8   :  { %2180 = vmatpush3.msra.mxu0 %v67_v16  ;;  %s2421_s17 = smov 104   ;;  %s2422_s20 = smov 40  }
   0x9   :  { %2181 = vmatprep.subr.mxu0 %v66_v17 }
   0xa   :  { %2182 = vmatpush3.msra.mxu0 %v66_v17 }
   0xb   :  { %2186 = vmatprep.subr.mxu0 %v2410_v28 }
  0x8c   :  { %v41_v4 = vpop.xlane.xlu0 %40 }
  0x8d   :  { %v46_v5 = vmul.f32 0.03125, %v41_v4 }
  0x8f   :  { %v48_v6 = vsub.f32 %v2484_v0, %v46_v5 }
  0x90   :  { %v44_v7 = vpop.xlane.xlu0 %43 }
  0x91   :  { %v47_v8 = vmul.f32 0.03125, %v44_v7  ;;  %v50_v9 = vmul.f32 %v48_v6, %v48_v6 }
  0x93   :  { %v49_v10 = vsub.f32 %v2489_v1, %v47_v8  ;;  %v52_v11 = vsel %vm38_vm0, %v50_v9, 0.0 }
  0x94   :  { %53 = vadd.xlane.f32.xlu1 %v52_v11 }
  0x95   :  { %v51_v12 = vmul.f32 %v49_v10, %v49_v10 }
  0x97   :  { %v55_v13 = vsel %vm38_vm0, %v51_v12, 0.0 }
  0x98   :  { %56 = vadd.xlane.f32.xlu1 %v55_v13 }
 0x11d   :  { %v54_v18 = vpop.xlane.xlu1 %53 }
 0x11e   :  { %v58_v19 = vmul.f32 0.03125, %v54_v18 }
 0x120   :  { %v60_v20 = vadd.f32 1e-05, %v58_v19 }
 0x121   :  { %v57_v21 = vpop.xlane.xlu1 %56 }
 0x122   :  { %2348 = vrsqrt.f32 %v60_v20  ;;  %v59_v22 = vmul.f32 0.03125, %v57_v21 }
 0x124   :  { %v61_v23 = vadd.f32 1e-05, %v59_v22 }
 0x126   :  { %2350 = vrsqrt.f32 %v61_v23 }
 0x12f   :  { %v2349_v24 = vpop.eup %2348 }
 0x130   :  { %v64_v25 = vmul.f32 %v2349_v24, %v48_v6 }
 0x132   :  { %2183 = vmatprep.mubr.msk.f32.mxu0 %vm38_vm0, %v64_v25 }
 0x133   :  { %v2351_v26 = vpop.eup %2350 }
 0x134   :  { %v65_v27 = vmul.f32 %v2351_v26, %v49_v10 }
 0x136   :  { %2184 = vmatmul.mubr.msk.f32.vlgmr.msra.gmra.mxu0 %vm38_vm0, %v65_v27 }
 0x137   :  { %2188 = vmatprep.mubr.msk.f32.mxu0 %vm2411_vm1, %v2410_v28 }
 0x1f6   :  { %v2185_v30 = vpop.f32.mrf.mxu0 }
 0x1f7   :  { %v2522_v31 = vadd.f32 %v2185_v30, %v2061_v29 }
 0x1f8   :  { %v149_v32 = vpop.f32.mrf.mxu0 }
 0x1f9   :  { %v2524_v33 = vadd.f32 %v2061_v29, %v149_v32  ;;  %242 = vrot.lane.b32.xlu1 %v2522_v31, %s2412_s25  ;;  %v159_v29 = vld [vmem:[%s2787_s4] sm:$0xff] }
 0x1fb   :  { %164 = vrot.lane.b32.xlu0 %v2524_v33, %s2412_s25 }
 0x26b   :  { %v243_v35 = vpop.permute.xlu1 %242 }
 0x26d   :  { %v165_v34 = vpop.permute.xlu0 %164 }
 0x26e   :  { %2187 = vmatpush3.xpose.msk.msra.mxu0 %vm166_vm2, %v165_v34 }
 0x26f   :  { %2191 = vmatprep.subr.mxu0 %v2410_v28 }
 0x271   :  { %2189 = vmatmul.mubr.msk.f32.vlgmr.msra.gmra.mxu0 %vm166_vm2, %v2524_v33 }
 0x272   :  { %2192 = vmatpush3.xpose.msk.msra.mxu0 %vm166_vm2, %v243_v35  ;;  %2193 = vmatprep.mubr.msk.f32.mxu0 %vm2411_vm1, %v2410_v28 }
 0x273   :  { %2196 = vmatprep.subr.mxu0 %v2410_v28 }
 0x275   :  { %2194 = vmatmul.mubr.msk.f32.vlgmr.msra.gmra.mxu0 %vm166_vm2, %v2522_v31 }
 0x276   :  { %2198 = vmatprep.mubr.msk.f32.mxu0 %vm2411_vm1, %v2410_v28 }
 0x331   :  { %v237_v37 = vpop.f32.mrf.mxu0 }
 0x332   :  { %v238_v38 = vadd.f32 %v237_v37, %v2543_v36 }
 0x333   :  { %v2190_v39 = vpop.f32.mrf.mxu0 }
 0x334   :  { %v318_v40 = vsel %vm166_vm2, %v238_v38, -inf }
 0x335   :  { %319 = vmax.xlane.f32.xlu1 %v318_v40  ;;  %v314_v41 = vpop.f32.mrf.mxu0 }
 0x336   :  { %v315_v42 = vadd.f32 %v314_v41, %v2543_v36 }
 0x337   :  { %v2195_v43 = vpop.f32.mrf.mxu0 }
 0x338   :  { %v321_v44 = vsel %vm166_vm2, %v315_v42, -inf  ;;  %v160_v43 = vld [vmem:[%s2787_s4 + $0x8] sm:$0xff] }
 0x339   :  { %322 = vmax.xlane.f32.xlu0 %v321_v44 }
 0x346   :  { %416 = vrot.lane.b32.xlu1 %v2522_v31, %s2413_s27 }
 0x34a   :  { %494 = vrot.lane.b32.xlu1 %v2524_v33, %s2414_s28 }
 0x34e   :  { %572 = vrot.lane.b32.xlu1 %v2522_v31, %s2414_s28 }
 0x3be   :  { %v320_v45 = vpop.xlane.xlu1 %319 }
 0x3bf   :  { %v324_v46 = vsub.f32 %v238_v38, %v320_v45 }
 0x3c1   :  { %v326_v47 = vmul.f32 1.442695, %v324_v46 }
 0x3c2   :  { %v417_v48 = vpop.permute.xlu1 %416  ;;  %v323_v49 = vpop.xlane.xlu0 %322 }
 0x3c3   :  { %2352 = vpow2.f32 %v326_v47  ;;  %v325_v50 = vsub.f32 %v315_v42, %v323_v49 }
 0x3c5   :  { %v328_v51 = vmul.f32 1.442695, %v325_v50 }
 0x3c6   :  { %v495_v52 = vpop.permute.xlu1 %494 }
 0x3c7   :  { %2354 = vpow2.f32 %v328_v51 }
 0x3ca   :  { %v573_v53 = vpop.permute.xlu1 %572 }
 0x3cb   :  { %2212 = vmatpush3.xpose.msk.msra.mxu1 %vm166_vm2, %v573_v53 }
 0x3cc   :  { %2221 = vmatprep.subr.mxu1 %v2410_v28 }
 0x3d0   :  { %v2353_v54 = vpop.eup %2352 }
 0x3d1   :  { %v330_v55 = vsel %vm166_vm2, %v2353_v54, 0.0 }
 0x3d2   :  { %331 = vadd.xlane.f32.xlu0 %v330_v55 }
 0x3d4   :  { %v2355_v56 = vpop.eup %2354 }
 0x3d5   :  { %v333_v57 = vsel %vm166_vm2, %v2355_v56, 0.0 }
 0x3d6   :  { %334 = vadd.xlane.f32.xlu1 %v333_v57 }
 0x3e7   :  { %570 = vrot.lane.b32.xlu1 %v2522_v31, %s2415_s1 }
 0x3e8   :  { %340 = vrot.lane.b32.xlu0 %v2524_v33, %s2413_s27 }
 0x3ec   :  { %492 = vrot.lane.b32.xlu0 %v2524_v33, %s2415_s1 }
 0x45b   :  { %v332_v58 = vpop.xlane.xlu0 %331 }
 0x45c   :  { %2356 = vrcp.f32 %v332_v58 }
 0x45f   :  { %v335_v59 = vpop.xlane.xlu1 %334  ;;  %v341_v60 = vpop.permute.xlu0 %340 }
 0x460   :  { %2358 = vrcp.f32 %v335_v59  ;;  %2197 = vmatpush3.msra.mxu0 %v341_v60 }
 0x461   :  { %2201 = vmatprep.subr.mxu0 %v2410_v28 }
 0x463   :  { %v571_v61 = vpop.permute.xlu1 %570  ;;  %v493_v4 = vpop.permute.xlu0 %492 }
 0x464   :  { %2214 = vmatmul.mubr.msk.f32.vlgmr.msra.gmra.mxu1 %vm166_vm2, %v571_v61 }
 0x465   :  { %2223 = vmatprep.mubr.msk.f32.mxu1 %vm2411_vm1, %v2410_v28 }
 0x469   :  { %v2357_v62 = vpop.eup %2356 }
 0x46a   :  { %v338_v63 = vmul.f32 %v2357_v62, %v2353_v54 }
 0x46c   :  { %2199 = vmatmul.mubr.msk.f32.vlgmr.msra.gmra.mxu0 %vm166_vm2, %v338_v63 }
 0x46d   :  { %v2359_v2 = vpop.eup %2358  ;;  %2202 = vmatpush3.msra.mxu0 %v417_v48  ;;  %2203 = vmatprep.mubr.msk.f32.mxu0 %vm2411_vm1, %v2410_v28 }
 0x46e   :  { %2206 = vmatprep.subr.mxu0 %v2410_v28  ;;  %v339_v3 = vmul.f32 %v2359_v2, %v2355_v56 }
 0x470   :  { %2204 = vmatmul.mubr.msk.f32.vlgmr.msra.gmra.mxu0 %vm166_vm2, %v339_v3 }
 0x471   :  { %2207 = vmatpush3.xpose.msk.msra.mxu0 %vm166_vm2, %v495_v52  ;;  %2208 = vmatprep.mubr.msk.f32.mxu0 %vm2411_vm1, %v2410_v28 }
 0x472   :  { %2216 = vmatprep.subr.mxu0 %v2410_v28 }
 0x474   :  { %2209 = vmatmul.mubr.msk.f32.vlgmr.msra.gmra.mxu0 %vm166_vm2, %v493_v4 }
 0x475   :  { %2218 = vmatprep.mubr.msk.f32.mxu0 %vm2411_vm1, %v2410_v28 }
 0x524   :  { %v644_v5 = vpop.f32.mrf.mxu1 }
 0x525   :  { %v645_v6 = vadd.f32 %v644_v5, %v2543_v36 }
 0x526   :  { %v2215_v7 = vpop.f32.mrf.mxu1 }
 0x527   :  { %v651_v8 = vsel %vm166_vm2, %v645_v6, -inf }
 0x528   :  { %652 = vmax.xlane.f32.xlu1 %v651_v8 }
 0x52c   :  { %v412_v9 = vpop.f32.mrf.mxu0 }
 0x52e   :  { %v2200_v10 = vpop.f32.mrf.mxu0 }
 0x530   :  { %v488_v11 = vpop.f32.mrf.mxu0 }
 0x532   :  { %v2205_v12 = vpop.f32.mrf.mxu0 }
 0x534   :  { %v566_v13 = vpop.f32.mrf.mxu0 }
 0x535   :  { %v567_v14 = vadd.f32 %v566_v13, %v2543_v36 }
 0x536   :  { %v2210_v15 = vpop.f32.mrf.mxu0 }
 0x537   :  { %v648_v16 = vsel %vm166_vm2, %v567_v14, -inf }
 0x538   :  { %649 = vmax.xlane.f32.xlu0 %v648_v16 }
 0x539   :  { %746 = vrot.lane.b32.xlu1 %v2522_v31, %s2416_s29 }
 0x53d   :  { %986 = vrot.lane.b32.xlu1 %v2524_v33, %s2417_s30 }
 0x541   :  { %1064 = vrot.lane.b32.xlu1 %v2522_v31, %s2417_s30 }
 0x545   :  { %1062 = vrot.lane.b32.xlu1 %v2522_v31, %s2418_s11 }
 0x5b1   :  { %v653_v17 = vpop.xlane.xlu1 %652 }
 0x5b2   :  { %v655_v18 = vsub.f32 %v645_v6, %v653_v17 }
 0x5b4   :  { %v658_v19 = vmul.f32 1.442695, %v655_v18 }
 0x5b5   :  { %v747_v20 = vpop.permute.xlu1 %746 }
 0x5b6   :  { %2360 = vpow2.f32 %v658_v19  ;;  %2222 = vmatpush3.msra.mxu1 %v747_v20 }
 0x5b7   :  { %2231 = vmatprep.subr.mxu1 %v159_v29 }
 0x5b9   :  { %v987_v32 = vpop.permute.xlu1 %986 }
 0x5bd   :  { %v1065_v38 = vpop.permute.xlu1 %1064 }
 0x5c1   :  { %v650_v21 = vpop.xlane.xlu0 %649  ;;  %v1063_v40 = vpop.permute.xlu1 %1062 }
 0x5c2   :  { %v654_v22 = vsub.f32 %v567_v14, %v650_v21  ;;  %v161_v21 = vld [vmem:[%s2787_s4 + $0x10] sm:$0xff] }
 0x5c3   :  { %v2361_v23 = vpop.eup %2360 }
 0x5c4   :  { %v656_v24 = vmul.f32 1.442695, %v654_v22  ;;  %v663_v25 = vsel %vm166_vm2, %v2361_v23, 0.0 }
 0x5c5   :  { %664 = vadd.xlane.f32.xlu0 %v663_v25 }
 0x5c6   :  { %2362 = vpow2.f32 %v656_v24 }
 0x5d3   :  { %v2363_v26 = vpop.eup %2362 }
 0x5d4   :  { %v660_v27 = vsel %vm166_vm2, %v2363_v26, 0.0 }
 0x5d5   :  { %661 = vadd.xlane.f32.xlu0 %v660_v27 }
 0x5eb   :  { %670 = vrot.lane.b32.xlu0 %v2524_v33, %s2416_s29 }
 0x5ef   :  { %984 = vrot.lane.b32.xlu0 %v2524_v33, %s2418_s11 }
 0x64e   :  { %v665_v30 = vpop.xlane.xlu0 %664 }
 0x64f   :  { %2364 = vrcp.f32 %v665_v30 }
 0x65c   :  { %v2365_v34 = vpop.eup %2364 }
 0x65d   :  { %v669_v35 = vmul.f32 %v2365_v34, %v2361_v23 }
 0x65e   :  { %v662_v37 = vpop.xlane.xlu0 %661 }
 0x65f   :  { %2366 = vrcp.f32 %v662_v37  ;;  %2224 = vmatmul.mubr.msk.f32.vlgmr.msra.gmra.mxu1 %vm166_vm2, %v669_v35 }
 0x660   :  { %2233 = vmatprep.mubr.msk.f32.mxu1 %vm166_vm2, %v412_v9  ;;  %2232 = vmatpush3.msra.mxu1 %v159_v29 }
 0x661   :  { %2241 = vmatprep.subr.mxu1 %v2410_v28 }
 0x662   :  { %v671_v39 = vpop.permute.xlu0 %670 }
 0x663   :  { %2217 = vmatpush3.msra.mxu0 %v671_v39  ;;  %2234 = vmatmul.mubr.msk.f32.vlgmr.msra.gmra.mxu1 %vm166_vm2, %v488_v11 }
 0x664   :  { %2242 = vmatpush3.xpose.msk.msra.mxu1 %vm166_vm2, %v1065_v38  ;;  %2243 = vmatprep.mubr.msk.f32.mxu1 %vm2411_vm1, %v2410_v28 }
 0x665   :  { %2251 = vmatprep.subr.mxu1 %v2410_v28  ;;  %2226 = vmatprep.subr.mxu0 %v160_v43 }
 0x666   :  { %v985_v54 = vpop.permute.xlu0 %984 }
 0x667   :  { %2244 = vmatmul.mubr.msk.f32.vlgmr.msra.gmra.mxu1 %vm166_vm2, %v1063_v40 }
 0x668   :  { %2253 = vmatprep.mubr.msk.f32.mxu1 %vm2411_vm1, %v2410_v28 }
 0x66c   :  { %v2367_v41 = vpop.eup %2366 }
 0x66d   :  { %v668_v42 = vmul.f32 %v2367_v41, %v2363_v26 }
 0x66f   :  { %2219 = vmatmul.mubr.msk.f32.vlgmr.msra.gmra.mxu0 %vm166_vm2, %v668_v42 }
 0x670   :  { %2227 = vmatpush3.msra.mxu0 %v160_v43 }
 0x671   :  { %2236 = vmatprep.subr.mxu0 %v2410_v28 }
 0x71f   :  { %v818_v44 = vpop.f32.mrf.mxu1 }
 0x721   :  { %v2225_v45 = vpop.f32.mrf.mxu1 }
 0x723   :  { %v2606_v46 = vpop.f32.mrf.mxu1 }
 0x725   :  { %v2608_v47 = vpop.f32.mrf.mxu1 }
 0x727   :  { %v1136_v48 = vpop.f32.mrf.mxu1 }
 0x728   :  { %v1137_v49 = vadd.f32 %v1136_v48, %v2543_v36 }
 0x729   :  { %v2245_v50 = vpop.f32.mrf.mxu1 }
 0x72a   :  { %v1143_v51 = vsel %vm166_vm2, %v1137_v49, -inf }
 0x72b   :  { %1144 = vmax.xlane.f32.xlu1 %v1143_v51 }
 0x72f   :  { %v742_v52 = vpop.f32.mrf.mxu0 }
 0x730   :  { %2228 = vmatprep.mubr.msk.f32.mxu0 %vm166_vm2, %v742_v52 }
 0x731   :  { %v2220_v53 = vpop.f32.mrf.mxu0  ;;  %2229 = vmatmul.mubr.msk.f32.vlgmr.msra.gmra.mxu0 %vm166_vm2, %v818_v44 }
 0x732   :  { %2237 = vmatpush3.xpose.msk.msra.mxu0 %vm166_vm2, %v987_v32  ;;  %2238 = vmatprep.mubr.msk.f32.mxu0 %vm2411_vm1, %v2410_v28 }
 0x733   :  { %2246 = vmatprep.subr.mxu0 %v2410_v28 }
 0x735   :  { %2239 = vmatmul.mubr.msk.f32.vlgmr.msra.gmra.mxu0 %vm166_vm2, %v985_v54 }
 0x736   :  { %2248 = vmatprep.mubr.msk.f32.mxu0 %vm2411_vm1, %v2410_v28 }
 0x73c   :  { %1238 = vrot.lane.b32.xlu1 %v2522_v31, %s2419_s16 }
 0x740   :  { %1399 = vrot.lane.b32.xlu1 %v2524_v33, %s2420_s0 }
 0x744   :  { %1477 = vrot.lane.b32.xlu1 %v2522_v31, %s2420_s0 }
 0x748   :  { %1475 = vrot.lane.b32.xlu1 %v2522_v31, %s2421_s17 }
 0x7b4   :  { %v1145_v55 = vpop.xlane.xlu1 %1144 }
 0x7b5   :  { %v1147_v57 = vsub.f32 %v1137_v49, %v1145_v55 }
 0x7b7   :  { %v1150_v58 = vmul.f32 1.442695, %v1147_v57 }
 0x7b8   :  { %v1239_v56 = vpop.permute.xlu1 %1238 }
 0x7b9   :  { %2252 = vmatpush3.msra.mxu1 %v1239_v56  ;;  %2368 = vpow2.f32 %v1150_v58 }
 0x7ba   :  { %2261 = vmatprep.subr.mxu1 %v2410_v28 }
 0x7bc   :  { %v1400_v13 = vpop.permute.xlu1 %1399 }
 0x7c0   :  { %v1478_v26 = vpop.permute.xlu1 %1477 }
 0x7c4   :  { %v1476_v30 = vpop.permute.xlu1 %1475 }
 0x7c6   :  { %v2369_v3 = vpop.eup %2368 }
 0x7c7   :  { %v1155_v4 = vsel %vm166_vm2, %v2369_v3, 0.0 }
 0x7f1   :  { %v2628_v59 = vpop.f32.mrf.mxu0 }
 0x7f2   :  { %v981_v39 = vadd.f32 %v2606_v46, %v2628_v59  ;;  %v162_v59 = vld [vmem:[%s2787_s4 + $0x18] sm:$0xff] }
 0x7f3   :  { %v2630_v60 = vpop.f32.mrf.mxu0 }
 0x7f4   :  { %v976_v41 = vadd.f32 %v2608_v47, %v2630_v60 }
 0x7f5   :  { %v1058_v61 = vpop.f32.mrf.mxu0 }
 0x7f6   :  { %v1059_v62 = vadd.f32 %v1058_v61, %v2543_v36 }
 0x7f7   :  { %v2240_v63 = vpop.f32.mrf.mxu0 }
 0x7f8   :  { %v1140_v2 = vsel %vm166_vm2, %v1059_v62, -inf }
 0x7f9   :  { %1141 = vmax.xlane.f32.xlu0 %v1140_v2 }
 0x7fd   :  { %1156 = vadd.xlane.f32.xlu0 %v1155_v4 }
 0x882   :  { %v1142_v5 = vpop.xlane.xlu0 %1141 }
 0x883   :  { %v1146_v6 = vsub.f32 %v1059_v62, %v1142_v5 }
 0x885   :  { %v1148_v7 = vmul.f32 1.442695, %v1146_v6 }
 0x886   :  { %v1157_v8 = vpop.xlane.xlu0 %1156 }
 0x887   :  { %2370 = vpow2.f32 %v1148_v7 }
 0x888   :  { %2372 = vrcp.f32 %v1157_v8 }
 0x894   :  { %v2371_v9 = vpop.eup %2370 }
 0x895   :  { %v2373_v10 = vpop.eup %2372  ;;  %v1152_v11 = vsel %vm166_vm2, %v2371_v9, 0.0 }
 0x896   :  { %1153 = vadd.xlane.f32.xlu0 %v1152_v11  ;;  %v1161_v12 = vmul.f32 %v2373_v10, %v2369_v3  ;;  %v2096_v3 = vld [vmem:[%s2788_s5] ss:$0 sm:$0xff] }
 0x898   :  { %2254 = vmatmul.mubr.msk.f32.vlgmr.msra.gmra.mxu1 %vm166_vm2, %v1161_v12 }
 0x899   :  { %2262 = vmatpush3.xpose.msk.msra.mxu1 %vm166_vm2, %v1400_v13  ;;  %2263 = vmatprep.mubr.msk.f32.mxu1 %vm2411_vm1, %v2410_v28 }
 0x89a   :  { %2271 = vmatprep.subr.mxu1 %v2410_v28 }
 0x8ac   :  { %1162 = vrot.lane.b32.xlu0 %v2524_v33, %s2419_s16 }
 0x8b0   :  { %1397 = vrot.lane.b32.xlu0 %v2524_v33, %s2421_s17 }
 0x91f   :  { %v1154_v14 = vpop.xlane.xlu0 %1153 }
 0x920   :  { %2374 = vrcp.f32 %v1154_v14 }
 0x923   :  { %v1163_v15 = vpop.permute.xlu0 %1162 }
 0x924   :  { %2247 = vmatpush3.msra.mxu0 %v1163_v15 }
 0x925   :  { %2256 = vmatprep.subr.mxu0 %v161_v21 }
 0x927   :  { %v1398_v16 = vpop.permute.xlu0 %1397 }
 0x928   :  { %2264 = vmatmul.mubr.msk.f32.vlgmr.msra.gmra.mxu1 %vm166_vm2, %v1398_v16 }
 0x929   :  { %2273 = vmatprep.mubr.msk.f32.mxu1 %vm2411_vm1, %v2410_v28 }
 0x92d   :  { %v2375_v17 = vpop.eup %2374 }
 0x92e   :  { %v1160_v18 = vmul.f32 %v2375_v17, %v2371_v9 }
 0x930   :  { %2249 = vmatmul.mubr.msk.f32.vlgmr.msra.gmra.mxu0 %vm166_vm2, %v1160_v18 }
 0x931   :  { %2257 = vmatpush3.msra.mxu0 %v161_v21  ;;  %v1849_v21 = vld [vmem:[%s2789_s6 + $0x10] sm:$0xff] }
 0x932   :  { %2266 = vmatprep.subr.mxu0 %v2410_v28 }
 0x958   :  { %v1310_v19 = vpop.f32.mrf.mxu1 }
 0x95a   :  { %v2255_v20 = vpop.f32.mrf.mxu1 }
 0x95b   :  { %v1850_v20 = vld [vmem:[%s2789_s6 + $0x18] sm:$0xff] }
 0x9e8   :  { %v1471_v22 = vpop.f32.mrf.mxu1 }
 0x9e9   :  { %v1472_v23 = vadd.f32 %v1471_v22, %v2543_v36  ;;  %v1848_v22 = vld [vmem:[%s2789_s6 + $0x8] sm:$0xff] }
 0x9ea   :  { %v2265_v24 = vpop.f32.mrf.mxu1 }
 0x9eb   :  { %v1553_v25 = vsel %vm166_vm2, %v1472_v23, -inf  ;;  %v1956_v24 = vld [vmem:[%s2791_s8 + $0x78] sm:$0xff] }
 0x9ec   :  { %1554 = vmax.xlane.f32.xlu0 %v1553_v25  ;;  %v1955_v25 = vld [vmem:[%s2791_s8 + $0x70] sm:$0xff] }
 0x9f0   :  { %v1234_v27 = vpop.f32.mrf.mxu0 }
 0x9f1   :  { %2258 = vmatprep.mubr.msk.f32.mxu0 %vm166_vm2, %v1234_v27  ;;  %v1953_v27 = vld [vmem:[%s2791_s8 + $0x60] sm:$0xff] }
 0x9f2   :  { %v2250_v29 = vpop.f32.mrf.mxu0  ;;  %2259 = vmatmul.mubr.msk.f32.vlgmr.msra.gmra.mxu0 %vm166_vm2, %v1310_v19 }
 0x9f3   :  { %2267 = vmatpush3.xpose.msk.msra.mxu0 %vm166_vm2, %v1478_v26  ;;  %2268 = vmatprep.mubr.msk.f32.mxu0 %vm2411_vm1, %v2410_v28  ;;  %v1954_v26 = vld [vmem:[%s2791_s8 + $0x68] sm:$0xff]  ;;  %v1952_v29 = vld [vmem:[%s2791_s8 + $0x58] sm:$0xff] }
 0x9f4   :  { %2276 = vmatprep.subr.mxu0 %v2410_v28 }
 0x9f6   :  { %2269 = vmatmul.mubr.msk.f32.vlgmr.msra.gmra.mxu0 %vm166_vm2, %v1476_v30  ;;  %v1951_v30 = vld [vmem:[%s2791_s8 + $0x50] sm:$0xff] }
 0x9f7   :  { %2278 = vmatprep.mubr.msk.f32.mxu0 %vm2411_vm1, %v2410_v28 }
 0xa75   :  { %v1555_v32 = vpop.xlane.xlu0 %1554 }
 0xa76   :  { %v1559_v34 = vsub.f32 %v1472_v23, %v1555_v32  ;;  %v1847_v23 = vld [vmem:[%s2789_s6] sm:$0xff]  ;;  %v1950_v32 = vld [vmem:[%s2791_s8 + $0x48] sm:$0xff] }
 0xa78   :  { %v1561_v35 = vmul.f32 1.442695, %v1559_v34  ;;  %v1949_v34 = vld [vmem:[%s2791_s8 + $0x40] sm:$0xff] }
 0xa7a   :  { %2376 = vpow2.f32 %v1561_v35  ;;  %v1948_v35 = vld [vmem:[%s2791_s8 + $0x38] sm:$0xff] }
 0xa87   :  { %v2377_v37 = vpop.eup %2376 }
 0xa88   :  { %v1565_v38 = vsel %vm166_vm2, %v2377_v37, 0.0 }
 0xa89   :  { %1566 = vadd.xlane.f32.xlu0 %v1565_v38  ;;  %v1946_v38 = vld [vmem:[%s2791_s8 + $0x28] sm:$0xff] }
 0xab2   :  { %v2260_v40 = vpop.f32.mrf.mxu0 }
 0xab3   :  { %v1396_v42 = vadd.f32 %v2260_v40, %v981_v39  ;;  %v1945_v39 = vld [vmem:[%s2791_s8 + $0x20] sm:$0xff] }
 0xab4   :  { %v1386_v43 = vpop.f32.mrf.mxu0 }
 0xab5   :  { %v1395_v44 = vadd.f32 %v1386_v43, %v976_v41 }
 0xab6   :  { %v1549_v45 = vpop.f32.mrf.mxu0 }
 0xab7   :  { %v1550_v28 = vadd.f32 %v1549_v45, %v2543_v36 }
 0xab8   :  { %v2270_v48 = vpop.f32.mrf.mxu0 }
 0xab9   :  { %v1556_v49 = vsel %vm166_vm2, %v1550_v28, -inf }
 0xaba   :  { %1557 = vmax.xlane.f32.xlu1 %v1556_v49 }
 0xacb   :  { %1651 = vrot.lane.b32.xlu1 %v2522_v31, %s2422_s20 }
 0xb12   :  { %v1567_v36 = vpop.xlane.xlu0 %1566 }
 0xb43   :  { %v1558_v50 = vpop.xlane.xlu1 %1557 }
 0xb44   :  { %v1560_v51 = vsub.f32 %v1550_v28, %v1558_v50 }
 0xb46   :  { %v1563_v46 = vmul.f32 1.442695, %v1560_v51  ;;  %v1944_v51 = vld [vmem:[%s2791_s8 + $0x18] sm:$0xff] }
 0xb47   :  { %v1652_v52 = vpop.permute.xlu1 %1651 }
 0xb48   :  { %2378 = vpow2.f32 %v1563_v46  ;;  %2277 = vmatpush3.msra.mxu0 %v1652_v52  ;;  %v1943_v46 = vld [vmem:[%s2791_s8 + $0x10] sm:$0xff]  ;;  %v1942_v52 = vld [vmem:[%s2791_s8 + $0x8] sm:$0xff] }
 0xb49   :  { %2380 = vrcp.f32 %v1567_v36  ;;  %2286 = vmatprep.subr.mxu0 %v1850_v20 }
 0xb55   :  { %v2379_v47 = vpop.eup %2378 }
 0xb56   :  { %v1568_v53 = vsel %vm166_vm2, %v2379_v47, 0.0  ;;  %v2381_v55 = vpop.eup %2380 }
 0xb57   :  { %1569 = vadd.xlane.f32.xlu0 %v1568_v53  ;;  %v1573_v57 = vmul.f32 %v2381_v55, %v2377_v37  ;;  %v1947_v37 = vld [vmem:[%s2791_s8 + $0x30] sm:$0xff]  ;;  %v2097_v53 = vld [vmem:[%s2790_s7] ss:$0 sm:$0xff] }
 0xb6d   :  { %1575 = vrot.lane.b32.xlu0 %v2524_v33, %s2422_s20 }
 0xbe0   :  { %v1570_v54 = vpop.xlane.xlu0 %1569 }
 0xbe1   :  { %2382 = vrcp.f32 %v1570_v54 }
 0xbe4   :  { %v1576_v56 = vpop.permute.xlu0 %1575 }
 0xbe5   :  { %2272 = vmatpush3.msra.mxu1 %v1576_v56 }
 0xbe6   :  { %2274 = vmatmul.mubr.msk.f32.vlgmr.msra.gmra.mxu1 %vm166_vm2, %v1573_v57  ;;  %2281 = vmatprep.subr.mxu1 %v162_v59 }
 0xbe7   :  { %2282 = vmatpush3.msra.mxu1 %v162_v59  ;;  %v2100_v59 = vld [vmem:[%s2792_s9] ss:$0 sm:$0xff] }
 0xbe8   :  { %2297 = vmatprep.subr.mxu1 %v1956_v24 }
 0xbee   :  { %v2383_v31 = vpop.eup %2382 }
 0xbef   :  { %v1574_v58 = vmul.f32 %v2383_v31, %v2379_v47  ;;  %v1941_v47 = vld [vmem:[%s2791_s8] sm:$0xff]  ;;  %s2423_s8 = smov [#allocation2]  }
 0xbf0   :  { %s2050_s16 = sshll.u32 %s2423_s8, 4  ;;  %s2051_s16 = int_to_ptr.vmem [resolvable:$true] %s2050_s16 }
 0xbf1   :  { %2279 = vmatmul.mubr.msk.f32.vlgmr.msra.gmra.mxu0 %vm166_vm2, %v1574_v58  ;;  %s2388_s7 = scalar_lea.vmem %s2051_s16, 256  ;;  %p2393_p1 = scmp.lt.s32.totalorder %s2051_s16, %s2051_s16 }
 0xbf2   :  { %2287 = vmatpush3.msra.mxu0 %v1850_v20  ;;  %p2389_p0 = scmp.ne.s32.totalorder %s2051_s16, %s2388_s7  ;;  %p2394_p2 = scmp.lt.s32.totalorder %s2388_s7, %s2388_s7 }
 0xbf3   :  { %2288 = vmatprep.subr.mxu0 %v1849_v21 }
 0xbf4   :  { %2289 = vmatpush3.msra.mxu0 %v1849_v21  ;;  %p2395_p3 = por %p2394_p2, %p2393_p1 }
 0xbf5   :  { %2290 = vmatprep.subr.mxu0 %v1848_v22 }
 0xbf6   :  { %2291 = vmatpush3.msra.mxu0 %v1848_v22  ;;  %p2396_p4 = pnand %p2395_p3, %p2389_p0 }
 0xbf7   :  { %2292 = vmatprep.subr.mxu0 %v1847_v23 }
 0xbf8   :  { %2293 = vmatpush3.msra.mxu0 %v1847_v23 }
 0xca6   :  { %v1647_v33 = vpop.f32.mrf.mxu1 }
 0xca7   :  { %2283 = vmatprep.mubr.msk.f32.mxu1 %vm166_vm2, %v1647_v33 }
 0xca8   :  { %v2275_v60 = vpop.f32.mrf.mxu1 }
 0xcb1   :  { %v1723_v61 = vpop.f32.mrf.mxu0 }
 0xcb2   :  { %2284 = vmatmul.mubr.msk.f32.vlgmr.msra.gmra.mxu1 %vm166_vm2, %v1723_v61 }
 0xcb3   :  { %v2280_v62 = vpop.f32.mrf.mxu0  ;;  %2298 = vmatpush3.msra.mxu1 %v1956_v24 }
 0xcb4   :  { %2299 = vmatprep.subr.mxu1 %v1955_v25 }
 0xcb5   :  { %2300 = vmatpush3.msra.mxu1 %v1955_v25 }
 0xcb6   :  { %2301 = vmatprep.subr.mxu1 %v1954_v26 }
 0xcb7   :  { %2302 = vmatpush3.msra.mxu1 %v1954_v26 }
 0xcb8   :  { %2303 = vmatprep.subr.mxu1 %v1953_v27 }
 0xcb9   :  { %2304 = vmatpush3.msra.mxu1 %v1953_v27 }
 0xcba   :  { %2305 = vmatprep.subr.mxu1 %v1952_v29 }
 0xcbb   :  { %2306 = vmatpush3.msra.mxu1 %v1952_v29 }
 0xcbc   :  { %2307 = vmatprep.subr.mxu1 %v1951_v30 }
 0xcbd   :  { %2308 = vmatpush3.msra.mxu1 %v1951_v30 }
 0xcbe   :  { %2309 = vmatprep.subr.mxu1 %v1950_v32 }
 0xcbf   :  { %2310 = vmatpush3.msra.mxu1 %v1950_v32 }
 0xcc0   :  { %2311 = vmatprep.subr.mxu1 %v1949_v34 }
 0xcc1   :  { %2312 = vmatpush3.msra.mxu1 %v1949_v34 }
 0xcc2   :  { %2313 = vmatprep.subr.mxu1 %v1948_v35 }
 0xcc3   :  { %2314 = vmatpush3.msra.mxu1 %v1948_v35 }
 0xcc4   :  { %2315 = vmatprep.subr.mxu1 %v1947_v37 }
 0xcc5   :  { %2316 = vmatpush3.msra.mxu1 %v1947_v37 }
 0xcc6   :  { %2317 = vmatprep.subr.mxu1 %v1946_v38 }
 0xcc7   :  { %2318 = vmatpush3.msra.mxu1 %v1946_v38 }
 0xcc8   :  { %2319 = vmatprep.subr.mxu1 %v1945_v39 }
 0xcc9   :  { %2320 = vmatpush3.msra.mxu1 %v1945_v39 }
 0xcca   :  { %2321 = vmatprep.subr.mxu1 %v1944_v51 }
 0xccb   :  { %2322 = vmatpush3.msra.mxu1 %v1944_v51 }
 0xccc   :  { %2323 = vmatprep.subr.mxu1 %v1943_v46 }
 0xccd   :  { %2324 = vmatpush3.msra.mxu1 %v1943_v46 }
 0xcce   :  { %2325 = vmatprep.subr.mxu1 %v1942_v52 }
 0xccf   :  { %2326 = vmatpush3.msra.mxu1 %v1942_v52 }
 0xcd0   :  { %2327 = vmatprep.subr.mxu1 %v1941_v47 }
 0xcd1   :  { %2328 = vmatpush3.msra.mxu1 %v1941_v47 }
 0xd72   :  { %v2285_v63 = vpop.f32.mrf.mxu1 }
 0xd73   :  { %v1809_v2 = vadd.f32 %v2285_v63, %v1396_v42 }
 0xd74   :  { %v1799_v4 = vpop.f32.mrf.mxu1 }
 0xd75   :  { %v1811_v5 = vadd.f32 %v1809_v2, %v2489_v1  ;;  %v1808_v6 = vadd.f32 %v1799_v4, %v1395_v44 }
 0xd77   :  { %v2685_v7 = vadd.f32 %v2096_v3, %v1811_v5  ;;  %v1810_v8 = vadd.f32 %v1808_v6, %v2484_v0 }
 0xd79   :  { %v2688_v9 = vadd.f32 %v2096_v3, %v1810_v8  ;;  %v1824_v10 = vsel %vm38_vm0, %v2685_v7, 0.0 }
 0xd7a   :  { %1825 = vadd.xlane.f32.xlu0 %v1824_v10 }
 0xd7b   :  { %v1821_v11 = vsel %vm38_vm0, %v2688_v9, 0.0 }
 0xd7c   :  { %1822 = vadd.xlane.f32.xlu1 %v1821_v11 }
 0xe03   :  { %v1826_v12 = vpop.xlane.xlu0 %1825 }
 0xe04   :  { %v1828_v13 = vmul.f32 0.03125, %v1826_v12 }
 0xe05   :  { %v1823_v14 = vpop.xlane.xlu1 %1822 }
 0xe06   :  { %v2695_v1 = vsub.f32 %v2685_v7, %v1828_v13  ;;  %v1827_v15 = vmul.f32 0.03125, %v1823_v14 }
 0xe08   :  { %v2698_v16 = vsub.f32 %v2688_v9, %v1827_v15  ;;  %v1832_v0 = vmul.f32 %v2695_v1, %v2695_v1 }
 0xe0a   :  { %v1836_v17 = vsel %vm38_vm0, %v1832_v0, 0.0  ;;  %v1831_v18 = vmul.f32 %v2698_v16, %v2698_v16 }
 0xe0b   :  { %1837 = vadd.xlane.f32.xlu1 %v1836_v17 }
 0xe0c   :  { %v1833_v19 = vsel %vm38_vm0, %v1831_v18, 0.0 }
 0xe0d   :  { %1834 = vadd.xlane.f32.xlu0 %v1833_v19 }
 0xe94   :  { %v1838_v40 = vpop.xlane.xlu1 %1837 }
 0xe95   :  { %v1840_v41 = vmul.f32 0.03125, %v1838_v40 }
 0xe96   :  { %v1835_v42 = vpop.xlane.xlu0 %1834 }
 0xe97   :  { %v1842_v43 = vadd.f32 1e-05, %v1840_v41  ;;  %v1839_v44 = vmul.f32 0.03125, %v1835_v42 }
 0xe99   :  { %v1841_v45 = vadd.f32 1e-05, %v1839_v44  ;;  %2384 = vrsqrt.f32 %v1842_v43 }
 0xe9b   :  { %2386 = vrsqrt.f32 %v1841_v45 }
 0xea6   :  { %v2385_v28 = vpop.eup %2384 }
 0xea7   :  { %v1846_v50 = vmul.f32 %v2385_v28, %v2695_v1 }
 0xea8   :  { %v2387_v48 = vpop.eup %2386 }
 0xea9   :  { %v1845_v49 = vmul.f32 %v2387_v48, %v2698_v16 }
 0xeab   :  { %2294 = vmatprep.mubr.msk.f32.mxu0 %vm38_vm0, %v1845_v49 }
 0xeac   :  { %2295 = vmatmul.mubr.msk.f32.vlgmr.msra.gmra.mxu0 %vm38_vm0, %v1846_v50 }
 0xf6c   :  { %v2296_v36 = vpop.f32.mrf.mxu0 }
 0xf6d   :  { %v1936_v54 = vadd.f32 %v2296_v36, %v2097_v53 }
 0xf6e   :  { %v1930_v55 = vpop.f32.mrf.mxu0 }
 0xf6f   :  { %v1931_v56 = vadd.f32 %v2097_v53, %v1930_v55  ;;  %v1940_v31 = vmax.f32 %v1936_v54, 0.0 }
 0xf71   :  { %v1939_v57 = vmax.f32 %v1931_v56, 0.0 }
 0xf73   :  { %2329 = vmatprep.mubr.f32.mxu1 %v1939_v57 }
 0xf74   :  { %2330 = vmatmul.mubr.f32.vlgmr.msra.gmra.mxu1 %v1940_v31 }
0x1034   :  { %v2331_v58 = vpop.f32.mrf.mxu1 }
0x1035   :  { %v2033_v33 = vadd.f32 %v2331_v58, %v2685_v7 }
0x1036   :  { %v2023_v60 = vpop.f32.mrf.mxu1 }
0x1037   :  { %v2042_v61 = vadd.f32 %v2100_v59, %v2033_v33  ;;  %v2032_v62 = vadd.f32 %v2023_v60, %v2688_v9 }
0x1039   :  { %2044 = vst.msk [vmem:[#allocation2 + $0x8] sm:$0xff] %vm38_vm0, %v2042_v61  ;;  %v2041_v63 = vadd.f32 %v2100_v59, %v2032_v62 }
0x103b   :  { %2043 = vst.msk [vmem:[#allocation2] sm:$0xff] %vm38_vm0, %v2041_v63 }
0x103c   :  { %2399 = shalt.err (!%p2396_p4)
}
0x103d   :  { %s2424_s9 = smov 128   ;;  %s2425_s0 = smov 8  }
0x103e   :  { %2056 = dma.vmem_to_hbm [thread:$0]  %s2051_s16, 256, %s2793_s10, [#allocation3], %s2424_s9, %s2424_s9, %s2425_s0  }
0x103f   :  { %2408 = dma.done.wait [#allocation3], 256  }
0x1040   :  { %2409 = vsyncadd [#allocation3], 4294967040 }
0x1041   :  { %2060 = vsyncpa [#allocation3], 1 }

</bundles_post_ra>
